<compile_context>
chip_gen: v6e
topology: v6e:2x2x1
jax: 0.10.0
libtpu: 0.0.40
codegen_flags: <defaults>
</compile_context>

<pallas_src>
import jax
import jax.numpy as jnp
from jax.experimental import pallas as pl
from jax.experimental.pallas import tpu as pltpu


def gcn_kernel(x_ref, adj_ref, wc_ref, bc_ref, wg_ref, bg_ref,
               scale_ref, shift_ref, o_ref, h_ref, g_ref):
    # grid = (batch, row_tile); edge types are a small static unrolled loop.
    s = pl.program_id(1)
    tS, Hout = o_ref.shape[1], o_ref.shape[2]
    E = adj_ref.shape[1]

    # Once per batch element: batched linears for all edge types.
    @pl.when(s == 0)
    def _():
        x = x_ref[0]                                                  # (S, Hin) f32
        # All E GraphConv linears as one wide MXU matmul; stored bf16 so the
        # per-tile A@h matmuls run on the full-rate bf16 MXU path.
        h = jnp.dot(x, wc_ref[...],
                    preferred_element_type=jnp.float32) + bc_ref[...]  # (S, E*Hout)
        for e in range(E):
            h_ref[e] = h[:, e * Hout:(e + 1) * Hout].astype(jnp.bfloat16)
        # All E gate logits in one small matmul (instead of E cross-lane reduces).
        gl = jnp.dot(x, wg_ref[...],
                     preferred_element_type=jnp.float32) + bg_ref[...]  # (S, E)
        g_ref[...] = jax.nn.sigmoid(gl)

    row0 = pl.multiple_of(s * tS, tS)
    g_tile = g_ref[pl.ds(row0, tS), :]                                 # (tS, E) f32

    acc = jnp.zeros((tS, Hout), jnp.float32)
    for e in range(E):                                                 # E small -> unroll
        a = adj_ref[0, e]                                              # (tS, S) bf16
        # bf16 x bf16 -> f32 accumulate on the MXU.
        ah = jnp.dot(a, h_ref[e], preferred_element_type=jnp.float32)  # (tS, Hout)
        # diag(gate) @ A @ h == gate * (A @ h): scale the small (tS,Hout) result.
        acc = acc + g_tile[:, e:e + 1] * ah

    # Eval-mode BatchNorm1d folded to a per-channel affine, then ReLU.
    y = acc * scale_ref[...] + shift_ref[...]
    o_ref[0] = jnp.maximum(y, 0.0).astype(o_ref.dtype)


def graph_convolution(x, adj, wg, bg, wc, bc, bn_scale, bn_shift):
    B, S, Hin = x.shape
    E = adj.shape[1]
    Hout = wc.shape[-1]

    # Row-tile size for adjacency / output (second-to-last block dim must be a
    # multiple of 8 or the full extent).
    if S % 256 == 0:
        tS = 256
    elif S % 128 == 0:
        tS = 128
    else:
        tS = S
    nS = S // tS

    adj_bf16 = adj.astype(jnp.bfloat16)            # 0/1 mask: exact in bf16
    wc_cat = wc.transpose(1, 0, 2).reshape(Hin, E * Hout)   # (Hin, E*Hout)
    bc_cat = bc.reshape(1, E * Hout)
    wg_all = wg.reshape(E, Hin).transpose()                  # (Hin, E)
    bg_row = bg.reshape(1, E)
    scale2 = bn_scale.reshape(1, Hout)
    shift2 = bn_shift.reshape(1, Hout)

    return pl.pallas_call(
        gcn_kernel,
        out_shape=jax.ShapeDtypeStruct((B, S, Hout), x.dtype),
        grid_spec=pltpu.PrefetchScalarGridSpec(
            num_scalar_prefetch=0,
            grid=(B, nS),
            in_specs=[
                pl.BlockSpec((1, S, Hin), lambda b, s: (b, 0, 0)),       # x (full rows)
                pl.BlockSpec((1, E, tS, S), lambda b, s: (b, 0, s, 0)),  # adj row-tile (bf16)
                pl.BlockSpec((Hin, E * Hout), lambda b, s: (0, 0)),      # Wc_cat (resident)
                pl.BlockSpec((1, E * Hout), lambda b, s: (0, 0)),        # bc_cat (resident)
                pl.BlockSpec((Hin, E), lambda b, s: (0, 0)),             # Wg_all (resident)
                pl.BlockSpec((1, E), lambda b, s: (0, 0)),               # bg (resident)
                pl.BlockSpec((1, Hout), lambda b, s: (0, 0)),            # bn scale
                pl.BlockSpec((1, Hout), lambda b, s: (0, 0)),            # bn shift
            ],
            out_specs=pl.BlockSpec((1, tS, Hout), lambda b, s: (b, s, 0)),
            scratch_shapes=[
                pltpu.VMEM((E, S, Hout), jnp.bfloat16),   # h_e for all edge types
                pltpu.VMEM((S, E), jnp.float32),          # gates for all edge types
            ],
        ),
        compiler_params=pltpu.CompilerParams(
            dimension_semantics=("parallel", "arbitrary"),
            vmem_limit_bytes=48 * 1024 * 1024,
        ),
    )(x, adj_bf16, wc_cat, bc_cat, wg_all, bg_row, scale2, shift2)


def reference_f32(x, adj, wg, bg, wc, bc, bn_scale, bn_shift):
    # Pure-JAX full-f32 reference of the forward pass (eval mode).
    E = adj.shape[1]
    acc = 0.0
    for e in range(E):
        gate = jax.nn.sigmoid(x @ wg[e] + bg[e])                 # (B, S, 1)
        h = x @ wc[e] + bc[e]                                    # (B, S, Hout)
        acc = acc + jnp.einsum('bst,bth->bsh', adj[:, e] * gate, h)
    y = acc * bn_scale + bn_shift
    return jnp.maximum(y, 0.0)


def reference_bf16(x, adj, wg, bg, wc, bc, bn_scale, bn_shift):
    # Precision-matched reference: adj and h fed to the A@h matmul in bf16 with
    # f32 accumulation, exactly like the kernel's MXU path.
    E = adj.shape[1]
    a16 = adj.astype(jnp.bfloat16)
    acc = 0.0
    for e in range(E):
        gate = jax.nn.sigmoid(x @ wg[e] + bg[e])
        h = (x @ wc[e] + bc[e]).astype(jnp.bfloat16)
        ah = jnp.einsum('bst,bth->bsh', a16[:, e], h,
                        preferred_element_type=jnp.float32)
        acc = acc + gate * ah
    y = acc * bn_scale + bn_shift
    return jnp.maximum(y, 0.0)


if __name__ == "__main__":
    B, S, Hin, Hout, E = 2, 8, 32, 32, 3
    key = jax.random.PRNGKey(0)
    ks = jax.random.split(key, 8)

    x = jax.random.normal(ks[0], (B, S, Hin), dtype=jnp.float32)
    adj = (jax.random.uniform(ks[1], (B, E, S, S)) > 0.5).astype(jnp.float32)

    # Deterministic parameter init (orthogonal-style via QR for GraphConv).
    def orth(k, m, n):
        q, _ = jnp.linalg.qr(jax.random.normal(k, (m, n), dtype=jnp.float32))
        return q[:, :n]

    wc = jnp.stack([orth(k, Hin, Hout) for k in jax.random.split(ks[2], E)])  # (E, Hin, Hout)
    bc = 0.01 * jax.random.normal(ks[3], (E, Hout), dtype=jnp.float32)
    wg_raw = jax.random.normal(ks[4], (E, Hin, 1), dtype=jnp.float32)
    wg = wg_raw / jnp.linalg.norm(wg_raw, axis=1, keepdims=True)              # (E, Hin, 1)
    bg = 0.01 * jax.random.normal(ks[5], (E, 1), dtype=jnp.float32)

    # BatchNorm1d (eval): gamma=1, beta=0, running_mean=0, running_var=1.
    eps = 1e-5
    gamma = jnp.ones((Hout,), jnp.float32)
    beta = jnp.zeros((Hout,), jnp.float32)
    running_mean = jnp.zeros((Hout,), jnp.float32)
    running_var = jnp.ones((Hout,), jnp.float32)
    bn_scale = gamma / jnp.sqrt(running_var + eps)
    bn_shift = beta - running_mean * bn_scale

    out = graph_convolution(x, adj, wg, bg, wc, bc, bn_scale, bn_shift)
    out = jax.block_until_ready(out)
    assert out.shape == (B, S, Hout)

    with jax.default_matmul_precision("float32"):
        ref32 = reference_f32(x, adj, wg, bg, wc, bc, bn_scale, bn_shift)
        ref16 = reference_bf16(x, adj, wg, bg, wc, bc, bn_scale, bn_shift)

    # Tight check against a reference that mirrors the kernel's intentional
    # bf16 MXU feed of (adj, h); loose check against the full-f32 math
    # (tolerance reflects bf16 rounding of h only — the adjacency is exact).
    assert jnp.allclose(out, ref16, atol=2e-2, rtol=2e-2), "mismatch vs bf16-matched reference"
    assert jnp.allclose(out, ref32, atol=5e-2, rtol=5e-2), "mismatch vs f32 reference"

    print("KERNEL_OK")
</pallas_src>

<mosaic_0001>
module attributes {stable_mosaic.version = 11 : i64} {
  func.func @gcn_kernel(%arg0: i32, %arg1: i32, %arg2: memref<1x8x32xf32, #tpu.memory_space<vmem>>, %arg3: memref<1x3x8x8xbf16, #tpu.memory_space<vmem>>, %arg4: memref<32x96xf32, #tpu.memory_space<vmem>>, %arg5: memref<1x96xf32, #tpu.memory_space<vmem>>, %arg6: memref<32x3xf32, #tpu.memory_space<vmem>>, %arg7: memref<1x3xf32, #tpu.memory_space<vmem>>, %arg8: memref<1x32xf32, #tpu.memory_space<vmem>>, %arg9: memref<1x32xf32, #tpu.memory_space<vmem>>, %arg10: memref<1x8x32xf32, #tpu.memory_space<vmem>>, %arg11: memref<3x8x32xbf16, #tpu.memory_space<vmem>>, %arg12: memref<8x3xf32, #tpu.memory_space<vmem>>) attributes {dimension_semantics = [#tpu.dimension_semantics<parallel>, #tpu.dimension_semantics<arbitrary>], iteration_bounds = array<i64: 2, 1>, scalar_prefetch = 0 : i64, scratch_operands = 2 : i64, tpu.core_type = #tpu.core_type<tc>, window_params = [{transform_indices = @transform_0, window_bounds = array<i64: 1, 8, 32>}, {transform_indices = @transform_1, window_bounds = array<i64: 1, 3, 8, 8>}, {pipeline_mode = #tpu.pipeline_mode<synchronous>, transform_indices = @transform_2, window_bounds = array<i64: 32, 96>}, {pipeline_mode = #tpu.pipeline_mode<synchronous>, transform_indices = @transform_3, window_bounds = array<i64: 1, 96>}, {pipeline_mode = #tpu.pipeline_mode<synchronous>, transform_indices = @transform_4, window_bounds = array<i64: 32, 3>}, {pipeline_mode = #tpu.pipeline_mode<synchronous>, transform_indices = @transform_5, window_bounds = array<i64: 1, 3>}, {pipeline_mode = #tpu.pipeline_mode<synchronous>, transform_indices = @transform_6, window_bounds = array<i64: 1, 32>}, {pipeline_mode = #tpu.pipeline_mode<synchronous>, transform_indices = @transform_7, window_bounds = array<i64: 1, 32>}, {transform_indices = @transform_8, window_bounds = array<i64: 1, 8, 32>}]} {
    %c0_i32 = arith.constant 0 : i32
    %0 = arith.cmpi eq, %arg1, %c0_i32 : i32
    %1 = arith.extui %0 : i1 to i32
    %c0_i32_0 = arith.constant 0 : i32
    %2 = arith.cmpi ne, %1, %c0_i32_0 : i32
    scf.if %2 {
      %c0_31 = arith.constant 0 : index
      %c0_32 = arith.constant 0 : index
      %c0_33 = arith.constant 0 : index
      %46 = vector.load %arg2[%c0_31, %c0_32, %c0_33] : memref<1x8x32xf32, #tpu.memory_space<vmem>>, vector<1x8x32xf32>
      %47 = vector.shape_cast %46 : vector<1x8x32xf32> to vector<8x32xf32>
      %c0_34 = arith.constant 0 : index
      %c0_35 = arith.constant 0 : index
      %48 = vector.load %arg4[%c0_34, %c0_35] : memref<32x96xf32, #tpu.memory_space<vmem>>, vector<32x96xf32>
      %cst_36 = arith.constant dense<0.000000e+00> : vector<8x96xf32>
      %49 = tpu.matmul %47, %48, %cst_36 {dimension_numbers = #tpu.dot_dimension_numbers<[1], [0], [0], [1], [0, 0, 1, 1], [], []>} : vector<8x32xf32>, vector<32x96xf32>, vector<8x96xf32> -> vector<8x96xf32>
      %c0_37 = arith.constant 0 : index
      %c0_38 = arith.constant 0 : index
      %50 = vector.load %arg5[%c0_37, %c0_38] : memref<1x96xf32, #tpu.memory_space<vmem>>, vector<1x96xf32>
      %51 = vector.broadcast %50 : vector<1x96xf32> to vector<8x96xf32>
      %52 = arith.addf %49, %51 : vector<8x96xf32>
      %53 = vector.extract_strided_slice %52 {offsets = [0, 0], sizes = [8, 32], strides = [1, 1]} : vector<8x96xf32> to vector<8x32xf32>
      %54 = arith.truncf %53 : vector<8x32xf32> to vector<8x32xbf16>
      %c0_39 = arith.constant 0 : index
      %c0_40 = arith.constant 0 : index
      %c0_41 = arith.constant 0 : index
      %55 = vector.load %arg11[%c0_39, %c0_40, %c0_41] : memref<3x8x32xbf16, #tpu.memory_space<vmem>>, vector<1x8x32xbf16>
      %56 = vector.shape_cast %55 : vector<1x8x32xbf16> to vector<8x32xbf16>
      %57 = vector.shape_cast %54 : vector<8x32xbf16> to vector<1x8x32xbf16>
      tpu.vector_store %arg11[%c0_39, %c0_40, %c0_41], %57 {strides = array<i32>} : memref<3x8x32xbf16, #tpu.memory_space<vmem>>, vector<1x8x32xbf16>,
      %58 = vector.extract_strided_slice %52 {offsets = [0, 32], sizes = [8, 32], strides = [1, 1]} : vector<8x96xf32> to vector<8x32xf32>
      %59 = arith.truncf %58 : vector<8x32xf32> to vector<8x32xbf16>
      %c1_42 = arith.constant 1 : index
      %c0_43 = arith.constant 0 : index
      %c0_44 = arith.constant 0 : index
      %60 = vector.load %arg11[%c1_42, %c0_43, %c0_44] : memref<3x8x32xbf16, #tpu.memory_space<vmem>>, vector<1x8x32xbf16>
      %61 = vector.shape_cast %60 : vector<1x8x32xbf16> to vector<8x32xbf16>
      %62 = vector.shape_cast %59 : vector<8x32xbf16> to vector<1x8x32xbf16>
      tpu.vector_store %arg11[%c1_42, %c0_43, %c0_44], %62 {strides = array<i32>} : memref<3x8x32xbf16, #tpu.memory_space<vmem>>, vector<1x8x32xbf16>,
      %63 = vector.extract_strided_slice %52 {offsets = [0, 64], sizes = [8, 32], strides = [1, 1]} : vector<8x96xf32> to vector<8x32xf32>
      %64 = arith.truncf %63 : vector<8x32xf32> to vector<8x32xbf16>
      %c2_45 = arith.constant 2 : index
      %c0_46 = arith.constant 0 : index
      %c0_47 = arith.constant 0 : index
      %65 = vector.load %arg11[%c2_45, %c0_46, %c0_47] : memref<3x8x32xbf16, #tpu.memory_space<vmem>>, vector<1x8x32xbf16>
      %66 = vector.shape_cast %65 : vector<1x8x32xbf16> to vector<8x32xbf16>
      %67 = vector.shape_cast %64 : vector<8x32xbf16> to vector<1x8x32xbf16>
      tpu.vector_store %arg11[%c2_45, %c0_46, %c0_47], %67 {strides = array<i32>} : memref<3x8x32xbf16, #tpu.memory_space<vmem>>, vector<1x8x32xbf16>,
      %c0_48 = arith.constant 0 : index
      %c0_49 = arith.constant 0 : index
      %68 = vector.load %arg6[%c0_48, %c0_49] : memref<32x3xf32, #tpu.memory_space<vmem>>, vector<32x3xf32>
      %cst_50 = arith.constant dense<0.000000e+00> : vector<8x3xf32>
      %69 = tpu.matmul %47, %68, %cst_50 {dimension_numbers = #tpu.dot_dimension_numbers<[1], [0], [0], [1], [0, 0, 1, 1], [], []>} : vector<8x32xf32>, vector<32x3xf32>, vector<8x3xf32> -> vector<8x3xf32>
      %c0_51 = arith.constant 0 : index
      %c0_52 = arith.constant 0 : index
      %70 = vector.load %arg7[%c0_51, %c0_52] : memref<1x3xf32, #tpu.memory_space<vmem>>, vector<1x3xf32>
      %71 = vector.broadcast %70 : vector<1x3xf32> to vector<8x3xf32>
      %72 = arith.addf %69, %71 : vector<8x3xf32>
      %73 = arith.negf %72 : vector<8x3xf32>
      %74 = math.exp %73 : vector<8x3xf32>
      %cst_53 = arith.constant 1.000000e+00 : f32
      %75 = vector.broadcast %cst_53 : f32 to vector<8x3xf32>
      %76 = arith.addf %75, %74 : vector<8x3xf32>
      %77 = arith.divf %75, %76 : vector<8x3xf32>
      %c0_54 = arith.constant 0 : index
      %c0_55 = arith.constant 0 : index
      %78 = vector.load %arg12[%c0_54, %c0_55] : memref<8x3xf32, #tpu.memory_space<vmem>>, vector<8x3xf32>
      tpu.vector_store %arg12[%c0_54, %c0_55], %77 {strides = array<i32>} : memref<8x3xf32, #tpu.memory_space<vmem>>, vector<8x3xf32>,
    } else {
    }
    %c8_i32 = arith.constant 8 : i32
    %3 = arith.muli %arg1, %c8_i32 : i32
    %4 = tpu.assume_multiple %3, 8 : i32
    %5 = arith.index_cast %4 : i32 to index
    %c0 = arith.constant 0 : index
    %6 = vector.load %arg12[%5, %c0] : memref<8x3xf32, #tpu.memory_space<vmem>>, vector<8x3xf32>
    %cst = arith.constant 0.000000e+00 : f32
    %7 = vector.broadcast %cst : f32 to vector<8x32xf32>
    %c0_1 = arith.constant 0 : index
    %c0_2 = arith.constant 0 : index
    %c0_3 = arith.constant 0 : index
    %c0_4 = arith.constant 0 : index
    %8 = vector.load %arg3[%c0_1, %c0_2, %c0_3, %c0_4] : memref<1x3x8x8xbf16, #tpu.memory_space<vmem>>, vector<1x1x8x8xbf16>
    %9 = vector.shape_cast %8 : vector<1x1x8x8xbf16> to vector<8x8xbf16>
    %c0_5 = arith.constant 0 : index
    %c0_6 = arith.constant 0 : index
    %c0_7 = arith.constant 0 : index
    %10 = vector.load %arg11[%c0_5, %c0_6, %c0_7] : memref<3x8x32xbf16, #tpu.memory_space<vmem>>, vector<1x8x32xbf16>
    %11 = vector.shape_cast %10 : vector<1x8x32xbf16> to vector<8x32xbf16>
    %cst_8 = arith.constant dense<0.000000e+00> : vector<8x32xf32>
    %12 = tpu.matmul %9, %11, %cst_8 {dimension_numbers = #tpu.dot_dimension_numbers<[1], [0], [0], [1], [0, 0, 1, 1], [], []>} : vector<8x8xbf16>, vector<8x32xbf16>, vector<8x32xf32> -> vector<8x32xf32>
    %13 = vector.extract_strided_slice %6 {offsets = [0, 0], sizes = [8, 1], strides = [1, 1]} : vector<8x3xf32> to vector<8x1xf32>
    %14 = vector.broadcast %13 : vector<8x1xf32> to vector<8x32xf32>
    %15 = arith.mulf %14, %12 : vector<8x32xf32>
    %16 = arith.addf %7, %15 : vector<8x32xf32>
    %c0_9 = arith.constant 0 : index
    %c1 = arith.constant 1 : index
    %c0_10 = arith.constant 0 : index
    %c0_11 = arith.constant 0 : index
    %17 = vector.load %arg3[%c0_9, %c1, %c0_10, %c0_11] : memref<1x3x8x8xbf16, #tpu.memory_space<vmem>>, vector<1x1x8x8xbf16>
    %18 = vector.shape_cast %17 : vector<1x1x8x8xbf16> to vector<8x8xbf16>
    %c1_12 = arith.constant 1 : index
    %c0_13 = arith.constant 0 : index
    %c0_14 = arith.constant 0 : index
    %19 = vector.load %arg11[%c1_12, %c0_13, %c0_14] : memref<3x8x32xbf16, #tpu.memory_space<vmem>>, vector<1x8x32xbf16>
    %20 = vector.shape_cast %19 : vector<1x8x32xbf16> to vector<8x32xbf16>
    %cst_15 = arith.constant dense<0.000000e+00> : vector<8x32xf32>
    %21 = tpu.matmul %18, %20, %cst_15 {dimension_numbers = #tpu.dot_dimension_numbers<[1], [0], [0], [1], [0, 0, 1, 1], [], []>} : vector<8x8xbf16>, vector<8x32xbf16>, vector<8x32xf32> -> vector<8x32xf32>
    %22 = vector.extract_strided_slice %6 {offsets = [0, 1], sizes = [8, 1], strides = [1, 1]} : vector<8x3xf32> to vector<8x1xf32>
    %23 = vector.broadcast %22 : vector<8x1xf32> to vector<8x32xf32>
    %24 = arith.mulf %23, %21 : vector<8x32xf32>
    %25 = arith.addf %16, %24 : vector<8x32xf32>
    %c0_16 = arith.constant 0 : index
    %c2 = arith.constant 2 : index
    %c0_17 = arith.constant 0 : index
    %c0_18 = arith.constant 0 : index
    %26 = vector.load %arg3[%c0_16, %c2, %c0_17, %c0_18] : memref<1x3x8x8xbf16, #tpu.memory_space<vmem>>, vector<1x1x8x8xbf16>
    %27 = vector.shape_cast %26 : vector<1x1x8x8xbf16> to vector<8x8xbf16>
    %c2_19 = arith.constant 2 : index
    %c0_20 = arith.constant 0 : index
    %c0_21 = arith.constant 0 : index
    %28 = vector.load %arg11[%c2_19, %c0_20, %c0_21] : memref<3x8x32xbf16, #tpu.memory_space<vmem>>, vector<1x8x32xbf16>
    %29 = vector.shape_cast %28 : vector<1x8x32xbf16> to vector<8x32xbf16>
    %cst_22 = arith.constant dense<0.000000e+00> : vector<8x32xf32>
    %30 = tpu.matmul %27, %29, %cst_22 {dimension_numbers = #tpu.dot_dimension_numbers<[1], [0], [0], [1], [0, 0, 1, 1], [], []>} : vector<8x8xbf16>, vector<8x32xbf16>, vector<8x32xf32> -> vector<8x32xf32>
    %31 = vector.extract_strided_slice %6 {offsets = [0, 2], sizes = [8, 1], strides = [1, 1]} : vector<8x3xf32> to vector<8x1xf32>
    %32 = vector.broadcast %31 : vector<8x1xf32> to vector<8x32xf32>
    %33 = arith.mulf %32, %30 : vector<8x32xf32>
    %34 = arith.addf %25, %33 : vector<8x32xf32>
    %c0_23 = arith.constant 0 : index
    %c0_24 = arith.constant 0 : index
    %35 = vector.load %arg8[%c0_23, %c0_24] : memref<1x32xf32, #tpu.memory_space<vmem>>, vector<1x32xf32>
    %36 = vector.broadcast %35 : vector<1x32xf32> to vector<8x32xf32>
    %37 = arith.mulf %34, %36 : vector<8x32xf32>
    %c0_25 = arith.constant 0 : index
    %c0_26 = arith.constant 0 : index
    %38 = vector.load %arg9[%c0_25, %c0_26] : memref<1x32xf32, #tpu.memory_space<vmem>>, vector<1x32xf32>
    %39 = vector.broadcast %38 : vector<1x32xf32> to vector<8x32xf32>
    %40 = arith.addf %37, %39 : vector<8x32xf32>
    %cst_27 = arith.constant 0.000000e+00 : f32
    %41 = vector.broadcast %cst_27 : f32 to vector<8x32xf32>
    %42 = arith.maximumf %40, %41 : vector<8x32xf32>
    %c0_28 = arith.constant 0 : index
    %c0_29 = arith.constant 0 : index
    %c0_30 = arith.constant 0 : index
    %43 = vector.load %arg10[%c0_28, %c0_29, %c0_30] : memref<1x8x32xf32, #tpu.memory_space<vmem>>, vector<1x8x32xf32>
    %44 = vector.shape_cast %43 : vector<1x8x32xf32> to vector<8x32xf32>
    %45 = vector.shape_cast %42 : vector<8x32xf32> to vector<1x8x32xf32>
    tpu.vector_store %arg10[%c0_28, %c0_29, %c0_30], %45 {strides = array<i32>} : memref<1x8x32xf32, #tpu.memory_space<vmem>>, vector<1x8x32xf32>,
    return
  }
  func.func @transform_0(%arg0: i32, %arg1: i32) -> (i32, i32, i32) {
    %c0_i32 = arith.constant 0 : i32
    %c0_i32_0 = arith.constant 0 : i32
    %c0_i32_1 = arith.constant 0 : i32
    return %arg0, %c0_i32, %c0_i32_0 : i32, i32, i32
  }
  func.func @transform_1(%arg0: i32, %arg1: i32) -> (i32, i32, i32, i32) {
    %c0_i32 = arith.constant 0 : i32
    %c0_i32_0 = arith.constant 0 : i32
    %c0_i32_1 = arith.constant 0 : i32
    return %arg0, %c0_i32, %arg1, %c0_i32_0 : i32, i32, i32, i32
  }
  func.func @transform_2(%arg0: i32, %arg1: i32) -> (i32, i32) {
    %c0_i32 = arith.constant 0 : i32
    %c0_i32_0 = arith.constant 0 : i32
    %c0_i32_1 = arith.constant 0 : i32
    return %c0_i32, %c0_i32_0 : i32, i32
  }
  func.func @transform_3(%arg0: i32, %arg1: i32) -> (i32, i32) {
    %c0_i32 = arith.constant 0 : i32
    %c0_i32_0 = arith.constant 0 : i32
    %c0_i32_1 = arith.constant 0 : i32
    return %c0_i32, %c0_i32_0 : i32, i32
  }
  func.func @transform_4(%arg0: i32, %arg1: i32) -> (i32, i32) {
    %c0_i32 = arith.constant 0 : i32
    %c0_i32_0 = arith.constant 0 : i32
    %c0_i32_1 = arith.constant 0 : i32
    return %c0_i32, %c0_i32_0 : i32, i32
  }
  func.func @transform_5(%arg0: i32, %arg1: i32) -> (i32, i32) {
    %c0_i32 = arith.constant 0 : i32
    %c0_i32_0 = arith.constant 0 : i32
    %c0_i32_1 = arith.constant 0 : i32
    return %c0_i32, %c0_i32_0 : i32, i32
  }
  func.func @transform_6(%arg0: i32, %arg1: i32) -> (i32, i32) {
    %c0_i32 = arith.constant 0 : i32
    %c0_i32_0 = arith.constant 0 : i32
    %c0_i32_1 = arith.constant 0 : i32
    return %c0_i32, %c0_i32_0 : i32, i32
  }
  func.func @transform_7(%arg0: i32, %arg1: i32) -> (i32, i32) {
    %c0_i32 = arith.constant 0 : i32
    %c0_i32_0 = arith.constant 0 : i32
    %c0_i32_1 = arith.constant 0 : i32
    return %c0_i32, %c0_i32_0 : i32, i32
  }
  func.func @transform_8(%arg0: i32, %arg1: i32) -> (i32, i32, i32) {
    %c0_i32 = arith.constant 0 : i32
    %c0_i32_0 = arith.constant 0 : i32
    return %arg0, %arg1, %c0_i32 : i32, i32, i32
  }
}

</mosaic_0001>

<bundles_post_ra>
// kernel: tpu_custom_call.1
= control target key start
LH: loop header
LB: loop body
LE: loop exit
PB: predicated region body
PF: predicated region fallthrough
CT: control target
= control target key end

     0   :  { %s1497_s0 = inlined_call_operand.hbm [shape: f32[2,8,32], index: 0, kind: input, shape index: {}]   ;;  %s1498_s1 = inlined_call_operand.hbm [shape: bf16[2,3,8,8], index: 1, kind: input, shape index: {}]   ;;  %s1499_s2 = inlined_call_operand.vmem [shape: f32[32,96], index: 2, kind: input, shape index: {}]   ;;  %s1500_s3 = inlined_call_operand.vmem [shape: f32[1,96], index: 3, kind: input, shape index: {}]   ;;  %s1501_s4 = inlined_call_operand.vmem [shape: f32[32,3], index: 4, kind: input, shape index: {}]   ;;  %s1502_s5 = inlined_call_operand.vmem [shape: f32[1,3], index: 5, kind: input, shape index: {}]   ;;  %s1503_s6 = inlined_call_operand.vmem [shape: f32[1,32], index: 6, kind: input, shape index: {}]   ;;  %s1504_s7 = inlined_call_operand.vmem [shape: f32[1,32], index: 7, kind: input, shape index: {}]   ;;  %s1505_s8 = inlined_call_operand.hbm [shape: f32[2,8,32], index: 8, kind: output, shape index: {}]  }
   0x1   :  { %1508 = sst [smem:[#allocation16_spill]] %s1497_s0 }
   0x2   :  { %13 = vsyncpa [#allocation5], 0 }
   0x3   :  { %15 = vsyncpa [#allocation5 + $0x1], 0 }
   0x4   :  { %16 = vsyncpa [#allocation8], 0 }
   0x5   :  { %18 = vsyncpa [#allocation8 + $0x1], 0 }
   0x6   :  { %19 = vsyncpa [#allocation6], 0 }
   0x7   :  { %21 = vsyncpa [#allocation6 + $0x1], 0  ;;  %s1255_s27 = smov 0   ;;  %s1257_s28 = smov 0  }
   0x8   :  { %s1259_s29 = smov 0   ;;  %s1261_s30 = smov 0  }
   0x9   :  { %s1263_s9 = smov 0   ;;  %s1265_s10 = smov 0  }
   0xa LB: > { %1509 = sst [smem:[#allocation13_spill]] %s1184_s29  ;;  %s886_s11 = sadd.s32 4294967295, %s1196_s10   ;;  %s1196_s10 = sphi %s1265_s10, %s27_s10   ;;  %s1192_s9 = sphi %s1263_s9, %s1526_s9   ;;  %s1188_s30 = sphi %s1261_s30, %s1525_s30   ;;  %s1184_s29 = sphi %s1259_s29, %s1521_s29   ;;  %s1180_s28 = sphi %s1257_s28, %s1524_s28   ;;  %s1176_s27 = sphi %s1255_s27, %s1523_s27  }
   0xb   : > { %s887_s12 = sadd.s32 4294967294, %s1196_s10   ;;  %s39_s13 = sadd.s32 1, %s1192_s9 }
   0xc   : > { %s46_s14 = sadd.s32 1, %s1184_s29  ;;  %p41_p0 = scmp.ge.s32.totalorder %s39_s13, 2 }
   0xd   : > { %p53_p1 = scmp.ne.s32.totalorder %s1184_s29, %s1180_s28  ;;  %p54_p2 = scmp.eq.s32.totalorder %s1196_s10, 0 }
   0xe   : > { %p59_p3 = scmp.ne.s32.totalorder %s1180_s28, %s1176_s27  ;;  %s1528_s13 = smov (%p41_p0, %s39_s13), 0 }
   0xf   : > { %1510 = sst [smem:[#allocation14_spill]] %s1528_s13  ;;  %p1296_p4 = por %p54_p2, %p53_p1 }
  0x10   : > { %p60_p5 = scmp.eq.s32.totalorder %s886_s11, 0  ;;  %s43_s16 = ssub.s32 %s1192_s9, %s1528_s13 }
  0x11   : > { %p239_p6 = scmp.eq.s32.totalorder %s886_s11, 1  ;;  %p44_p7 = scmp.eq.s32.totalorder %s43_s16, 0 }
  0x12   : > { %p1302_p8 = por %p60_p5, %p59_p3  ;;  %p245_p10 = scmp.eq.s32.totalorder %s887_s12, 1 }
  0x13   : > { %p1306_p9 = por %p239_p6, %p53_p1  ;;  %p990_p13 = scmp.lt.s32.totalorder %s1196_s10, 2 }
  0x14   : > { %s1311_s19 = scalar_select %p44_p7, %s1184_s29, %s46_s14  }
  0x15   : > { %p1313_p11 = por %p245_p10, %p59_p3  ;;  %s1320_s21 = sand.u32 1, %s1184_s29  }
  0x16   : > { %1514 = sst [smem:[#allocation15_spill]] %s1311_s19  ;;  %s890_s22 = sshll.u32 %s1320_s21, 3 }
  0x17   : > { %s891_s23 = sshll.u32 %s1192_s9, 7  ;;  %s1516_s0 = sld [smem:[#allocation16_spill]] }
  0x18   : > { %s287_s11 = scalar_lea.vmem [#allocation4], %s890_s22  ;;  %p1329_p0 = pnand %p990_p13, %p1296_p4 }
  0x19   : > { %s294_s12 = sshll.u32 %s287_s11, 4  ;;  %p893_p1 = scmp.ge.s32.totalorder %s1196_s10, 1  ;;  %s295_s12 = int_to_ptr.vmem [resolvable:$true] %s294_s12 }
  0x1a   : > { %p321_p2 = scmp.lt.s32.totalorder %s1196_s10, 3  ;;  %s284_s16 = scalar_lea.sflag [#allocation5], %s1320_s21 }
  0x1b   : > { %p1058_p3 = pneg %p1329_p0  ;;  %s1069_s13 = scalar_lea.vmem %s295_s12, 128 }
  0x1c   : > { %p1070_p5 = scmp.ne.s32.totalorder %s295_s12, %s1069_s13  ;;  %s1198_s22 = smov [#allocation4]  }
  0x1d   : > { %s292_s26 = scalar_lea.hbm %s1516_s0, %s891_s23  ;;  %s1074_s23 = sshll.u32 %s1198_s22, 4  ;;  %s1075_s23 = int_to_ptr.vmem [resolvable:$false] %s1074_s23 }
  0x1e   : > { %p1072_p6 = pnand %p1070_p5, %p1058_p3  ;;  %s1076_s15 = scalar_lea.vmem %s1075_s23, 256 }
  0x1f   : > { %p1077_p4 = scmp.lt.s32.totalorder %s295_s12, %s1075_s23  ;;  %p1078_p10 = scmp.lt.s32.totalorder %s1076_s15, %s1069_s13 }
  0x20   : > { %p1073_p7 = pneg %p1072_p6 }
  0x21   : > { %p1079_p13 = por %p1078_p10, %p1077_p4 }
  0x23   : > { %p1080_p12 = pnand %p1079_p13, %p1073_p7 }
  0x25   : > { %1083 = shalt.err (!%p1080_p12)
}
  0x26   : > { %982 = dma.hbm_to_vmem [thread:$0]  (!%p1329_p0), %s292_s26, 128, %s295_s12, %s284_s16  }
  0x27   : > { %p1347_p5 = pnand %p893_p1, %p321_p2  ;;  %s970_s25 = smul.u32 12, %s1320_s21 }
  0x28   : > { %s971_s13 = smul.u32 192, %s1192_s9  ;;  %s302_s19 = scalar_lea.sflag [#allocation8], %s1320_s21 }
  0x29   : > { %s305_s15 = scalar_lea.vmem [#allocation7], %s970_s25  ;;  %s1199_s26 = smov [#allocation7]  }
  0x2a   : > { %s312_s23 = scalar_lea.hbm %s1498_s1, %s971_s13  ;;  %s313_s0 = sshll.u32 %s305_s15, 4  ;;  %s314_s0 = int_to_ptr.vmem [resolvable:$true] %s313_s0 }
  0x2b   : > { %s1097_s29 = scalar_lea.vmem %s314_s0, 192  ;;  %s1102_s12 = sshll.u32 %s1199_s26, 4  ;;  %s1103_s12 = int_to_ptr.vmem [resolvable:$false] %s1102_s12 }
  0x2c   : > { %p1098_p12 = scmp.ne.s32.totalorder %s314_s0, %s1097_s29  ;;  %s1104_s16 = scalar_lea.vmem %s1103_s12, 384 }
  0x2d   : > { %p1105_p1 = scmp.lt.s32.totalorder %s314_s0, %s1103_s12  ;;  %p1106_p2 = scmp.lt.s32.totalorder %s1104_s16, %s1097_s29 }
  0x2e   : > { %p1100_p6 = pnand %p1098_p12, %p1058_p3 }
  0x2f   : > { %p1107_p4 = por %p1106_p2, %p1105_p1 }
  0x30   : > { %p1101_p7 = pneg %p1100_p6 }
  0x32   : > { %p1108_p10 = pnand %p1107_p4, %p1101_p7 }
  0x34   : > { %1111 = shalt.err (!%p1108_p10)
}
  0x35   : > { %s1200_s13 = smov 64   ;;  %s1201_s25 = smov 4  }
  0x36   : > { %985 = dma.hbm_to_vmem [thread:$0]  (!%p1329_p0), %s312_s23, 192, %s314_s0, %s302_s19, %s1200_s13, %s1200_s13, %s1201_s25  }
  0x37   : > { %325 = sbr.rel (%p1347_p5) target bundleno = 619 (0x26b), region = 52  ;;  %s1365_s21 = sand.u32 (!%p1347_p5), 1, %s1180_s28  }
  0x38   : > { %s894_s11 = sshll.u32 (!%p1347_p5), %s1365_s21, 3  ;;  %s328_s29 = scalar_lea.sflag (!%p1347_p5), [#allocation5], %s1365_s21 }
  0x39   : > { %s331_s22 = scalar_lea.vmem (!%p1347_p5), [#allocation4], %s894_s11 }
  0x3c   : > { %1163 = dma.done.wait (%p1302_p8), %s328_s29, 128  }
  0x3d   : > { %1165 = vsyncadd (%p1302_p8), %s328_s29, 4294967168  ;;  %s972_s0 = smul.u32 12, %s1365_s21  ;;  %s337_s19 = scalar_lea.sflag [#allocation8], %s1365_s21 }
  0x3f   : > { %s1377_s14 = scalar_lea.vmem [#allocation7], %s972_s0 }
  0x40   : > { %1167 = dma.done.wait (%p1302_p8), %s337_s19, 192  }
  0x41   : > { %1169 = vsyncadd (%p1302_p8), %s337_s19, 4294967104  ;;  %v1202_v0 = vmov 0.0   ;;  %vm1203_vm0 = vmmov 0   ;;  %v387_v1 = vld [vmem:[%s1499_s2 + $0x18] sm:$0xff]  ;;  %v386_v2 = vld [vmem:[%s1499_s2 + $0x10] sm:$0xff]  ;;  %vm395_vm1 = vcmask 261120  }
  0x42   : > { %930 = vmatprep.subr.mxu0 %v1202_v0  ;;  %938 = vmatprep.mubr.msk.f32.mxu0 %vm1203_vm0, %v1202_v0  ;;  %v488_v3 = vld [vmem:[%s1501_s4 + $0x18] sm:$0xff]  ;;  %v385_v4 = vld [vmem:[%s1499_s2 + $0x8] sm:$0xff]  ;;  %v487_v5 = vld [vmem:[%s1501_s4 + $0x10] sm:$0xff]  ;;  %vm470_vm2 = vcmask 257024   ;;  %s1204_s12 = smov 96   ;;  %s1205_s25 = smov 64  }
  0x43   : > { %941 = vmatprep.subr.mxu1 %v1202_v0  ;;  %949 = vmatprep.mubr.msk.f32.mxu1 %vm1203_vm0, %v1202_v0  ;;  %v486_v6 = vld [vmem:[%s1501_s4 + $0x8] sm:$0xff]  ;;  %v384_v7 = vld [vmem:[%s1499_s2] sm:$0xff]  ;;  %v1206_v18 = vmov 0   ;;  %vm583_vm3 = vcmask 1043456   ;;  %v1207_v20 = vmov 2   ;;  %vm579_vm4 = vcmask 64512  }
  0x44   : > { %931 = vmatpush3.msra.mxu0 %v387_v1  ;;  %942 = vmatpush3.msra.mxu1 %v488_v3  ;;  %v383_v8 = vld [vmem:[%s331_s22] sm:$0xff]  ;;  %v577_v24 = vld [vmem:[%s1377_s14] sm:$0xf]  ;;  %vm572_vm5 = vcmask 23552   ;;  %v1208_v29 = vmov 1   ;;  %s910_s24 = sshll.u32 %s1188_s30, 7 }
  0x45   : > { %932 = vmatprep.subr.mxu0 %v1202_v0  ;;  %943 = vmatprep.subr.mxu1 %v1202_v0  ;;  %v485_v9 = vld [vmem:[%s1501_s4] sm:$0xff]  ;;  %v903_v34 = vld [vmem:[%s1377_s14 + $0x4] sm:$0xf]  ;;  %v905_v37 = vld [vmem:[%s1377_s14 + $0x8] sm:$0xf]  ;;  %s377_s23 = scalar_lea.vmem [#allocation9], %s894_s11  ;;  %s778_s17 = scalar_lea.hbm %s1505_s8, %s910_s24 }
  0x46   : > { %933 = vmatpush3.msra.mxu0 %v386_v2  ;;  %944 = vmatpush3.msra.mxu1 %v487_v5  ;;  %v896_v10 = vld [vmem:[%s1500_s3] ss:$0 sm:$0xff]  ;;  %s780_s15 = sshll.u32 %s377_s23, 4  ;;  %s1209_s13 = smov [#allocation9]   ;;  %s781_s15 = int_to_ptr.vmem [resolvable:$true] %s780_s15 }
  0x47   : > { %934 = vmatprep.subr.mxu0 %v1202_v0  ;;  %945 = vmatprep.subr.mxu1 %v1202_v0  ;;  %v899_v15 = vld [vmem:[%s1502_s5] ss:$0 sm:$0xff]  ;;  %s1112_s16 = scalar_lea.vmem %s781_s15, 128  ;;  %s1116_s30 = sshll.u32 %s1209_s13, 4  ;;  %s1117_s30 = int_to_ptr.vmem [resolvable:$false] %s1116_s30 }
  0x48   : > { %935 = vmatpush3.msra.mxu0 %v385_v4  ;;  %946 = vmatpush3.msra.mxu1 %v486_v6  ;;  %v907_v53 = vld [vmem:[%s1503_s6] ss:$0 sm:$0xff]  ;;  %p1113_p8 = scmp.ne.s32.totalorder %s781_s15, %s1112_s16  ;;  %s1118_s11 = scalar_lea.vmem %s1117_s30, 256 }
  0x49   : > { %936 = vmatprep.subr.mxu0 %v1202_v0  ;;  %947 = vmatprep.subr.mxu1 %v1202_v0  ;;  %v908_v57 = vld [vmem:[%s1504_s7] ss:$0 sm:$0xff]  ;;  %p1119_p13 = scmp.lt.s32.totalorder %s781_s15, %s1117_s30  ;;  %p1120_p5 = scmp.lt.s32.totalorder %s1118_s11, %s1112_s16 }
  0x4a   : > { %937 = vmatpush3.msra.mxu0 %v384_v7  ;;  %948 = vmatpush3.msra.mxu1 %v485_v9  ;;  %p1114_p0 = pnand %p1113_p8, %p1306_p9 }
  0x4b   : > { %939 = vmatmul.mubr.msk.f32.vlgmr.msra.gmra.mxu0 %vm395_vm1, %v383_v8  ;;  %950 = vmatmul.mubr.msk.f32.vlgmr.msra.gmra.mxu1 %vm395_vm1, %v383_v8  ;;  %p1121_p12 = por %p1120_p5, %p1119_p13 }
  0x4c   : > { %952 = vmatprep.subr.bf16.mxu0 %v1202_v0  ;;  %954 = vmatprep.mubr.msk.bf16.mxu0 %vm1203_vm0, %v1202_v0  ;;  %p1115_p3 = pneg %p1114_p0 }
  0x4d   : > { %958 = vmatprep.subr.bf16.mxu1 %v1202_v0  ;;  %960 = vmatprep.mubr.msk.bf16.mxu1 %vm1203_vm0, %v1202_v0 }
  0x4e   : > { %1049 = vset.pattern.permute.xlu1 %v1206_v18  ;;  %1051 = vset.pattern.permute.xlu0 %v1207_v20  ;;  %p1122_p6 = pnand %p1121_p12, %p1115_p3 }
 0x10b   : > { %v465_v11 = vpop.f32.mrf.mxu0  ;;  %v562_v16 = vpop.f32.mrf.mxu1 }
 0x10c   : > { %v466_v12 = vadd.f32 %v896_v10, %v465_v11  ;;  %v563_v17 = vadd.f32 %v899_v15, %v562_v16 }
 0x10d   : > { %v940_v13 = vpop.f32.mrf.mxu0  ;;  %v951_v19 = vpop.f32.mrf.mxu1 }
 0x10e   : > { %v469_v14 = vpack.c.bf16 %v466_v12, %v466_v12  ;;  %v901_v21 = vmul.f32 -1.442695, %v563_v17 }
 0x110   : > { %471 = vst.msk [vmem:[#allocation2] sm:$0xf] %vm470_vm2, %v469_v14  ;;  %475 = vrot.lane.b32.xlu0 %v469_v14, %s1204_s12  ;;  %1052 = vpow2.f32 %v901_v21  ;;  %s766_s12 = scalar_lea.sflag [#allocation6], %s1365_s21 }
 0x114   : > { %480 = vrot.lane.b32.xlu0 %v469_v14, %s1205_s25 }
 0x117   : > { %v578_v22 = vld [vmem:[#allocation2] sm:$0xf] }
 0x118   : > { %v585_v23 = vsel %vm583_vm3, %v578_v22, 0 }
 0x119   : > { %953 = vmatpush3.bf16.msra.mxu0 %v585_v23 }
 0x11a   : > { %964 = vmatprep.subr.bf16.mxu0 %v1202_v0 }
 0x11c   : > { %955 = vmatmul.mubr.msk.bf16.vlgmr.msra.gmra.mxu0 %vm579_vm4, %v577_v24 }
 0x11d   : > { %966 = vmatprep.mubr.msk.bf16.mxu0 %vm1203_vm0, %v1202_v0  ;;  %v1053_v25 = vpop.eup %1052 }
 0x11e   : > { %v569_v26 = vadd.f32 1.0, %v1053_v25 }
 0x120   : > { %1054 = vrcp.f32 %v569_v26 }
 0x12d   : > { %v1055_v27 = vpop.eup %1054 }
 0x12e   : > { %573 = vst.msk [vmem:[#allocation3] sm:$0xff] %vm572_vm5, %v1055_v27 }
 0x135   : > { %v576_v28 = vld [vmem:[#allocation3] sm:$0xff] }
 0x136   : > { %629 = vperm.xlu1 %1049, %v576_v28   ;;  %741 = vperm.xlu0 %1051, %v576_v28  }
 0x13a   : > { %1050 = vset.pattern.permute.xlu1 %v1208_v29 }
 0x13b   : > { %685 = vperm.xlu1 %1050, %v576_v28  }
 0x182   : > { %v476_v30 = vpop.permute.xlu0 %475 }
 0x183   : > { %479 = vst.msk [vmem:[#allocation2 + $0x4] sm:$0xf] %vm470_vm2, %v476_v30 }
 0x186   : > { %v481_v31 = vpop.permute.xlu0 %480 }
 0x187   : > { %484 = vst.msk [vmem:[#allocation2 + $0x8] sm:$0xf] %vm470_vm2, %v481_v31 }
 0x18a   : > { %v637_v32 = vld [vmem:[#allocation2 + $0x4] sm:$0xf] }
 0x18b   : > { %v642_v33 = vsel %vm583_vm3, %v637_v32, 0 }
 0x18c   : > { %959 = vmatpush3.bf16.msra.mxu1 %v642_v33 }
 0x18e   : > { %v693_v35 = vld [vmem:[#allocation2 + $0x8] sm:$0xf] }
 0x18f   : > { %961 = vmatmul.mubr.msk.bf16.vlgmr.msra.gmra.mxu1 %vm579_vm4, %v903_v34  ;;  %v698_v36 = vsel %vm583_vm3, %v693_v35, 0 }
 0x190   : > { %965 = vmatpush3.bf16.msra.mxu0 %v698_v36 }
 0x193   : > { %967 = vmatmul.mubr.msk.bf16.vlgmr.msra.gmra.mxu0 %vm579_vm4, %v905_v37 }
 0x1b1   : > { %v630_v42 = vpop.permute.xlu1 %629  ;;  %v742_v48 = vpop.permute.xlu0 %741 }
 0x1b6   : > { %v686_v43 = vpop.permute.xlu1 %685 }
 0x1dc   : > { %v621_v38 = vpop.f32.mrf.mxu0 }
 0x1dd   : > { %v632_v47 = vmul.f32 %v630_v42, %v621_v38 }
 0x1de   : > { %v956_v39 = vpop.f32.mrf.mxu0 }
 0x1e0   : > { %v624_v40 = vpop.f32.mrf.mxu0 }
 0x1e2   : > { %v957_v41 = vpop.f32.mrf.mxu0 }
 0x24f   : > { %v678_v44 = vpop.f32.mrf.mxu1 }
 0x250   : > { %v688_v45 = vmul.f32 %v686_v43, %v678_v44 }
 0x251   : > { %v962_v46 = vpop.f32.mrf.mxu1 }
 0x252   : > { %v689_v51 = vadd.f32 %v688_v45, %v632_v47 }
 0x253   : > { %v734_v49 = vpop.f32.mrf.mxu0  ;;  %v681_v50 = vpop.f32.mrf.mxu1 }
 0x254   : > { %v744_v52 = vmul.f32 %v742_v48, %v734_v49 }
 0x255   : > { %v968_v54 = vpop.f32.mrf.mxu0  ;;  %v963_v55 = vpop.f32.mrf.mxu1 }
 0x256   : > { %v745_v56 = vadd.f32 %v744_v52, %v689_v51 }
 0x257   : > { %v737_v58 = vpop.f32.mrf.mxu0 }
 0x258   : > { %v753_v59 = vmul.f32 %v907_v53, %v745_v56 }
 0x259   : > { %v969_v60 = vpop.f32.mrf.mxu0 }
 0x25a   : > { %v761_v61 = vadd.f32 %v908_v57, %v753_v59 }
 0x25c   : > { %v762_v62 = vmax.f32 %v761_v61, 0.0 }
 0x25e   : > { %764 = vst.msk [vmem:[%s377_s23] sm:$0xff] %vm395_vm1, %v762_v62 }
 0x25f   : > { %1125 = shalt.err (!%p1122_p6)
}
 0x260   : > { %s1126_s25 = scalar_lea.hbm %s778_s17, 128  ;;  %s1130_s29 = scalar_lea.hbm %s1505_s8, 256 }
 0x261   : > { %p1127_p7 = scmp.ne.s32.totalorder %s778_s17, %s1126_s25  ;;  %p1131_p4 = scmp.lt.s32.totalorder %s778_s17, %s1505_s8 }
 0x262   : > { %p1132_p10 = scmp.lt.s32.totalorder %s1130_s29, %s1126_s25 }
 0x263   : > { %p1128_p1 = pnand %p1127_p7, %p1306_p9 }
 0x264   : > { %p1133_p8 = por %p1132_p10, %p1131_p4 }
 0x265   : > { %p1129_p2 = pneg %p1128_p1 }
 0x267   : > { %p1134_p0 = pnand %p1133_p8, %p1129_p2 }
 0x269   : > { %1137 = shalt.err (!%p1134_p0)
}
 0x26a   : > { %977 = dma.vmem_to_hbm [thread:$0]  (%p1306_p9), %s781_s15, 128, %s778_s17, %s766_s12  }
 0x26b PF: > { %s792_s24 = sand.u32 1, %s1176_s27   ;;  %p1519_p3 = scmp.ge.s32.totalorder %s1196_s10, 2 }
 0x26c   : > { %s793_s23 = scalar_lea.sflag [#allocation6], %s792_s24 }
 0x26d   : > { %p987_p13 = pnand %p1519_p3, %p1313_p11 }
 0x26f   : > { %p988_p5 = pneg %p987_p13 }
 0x271   : > { %1171 = dma.done.wait (%p988_p5), %s793_s23, 128  }
 0x272   : > { %1173 = vsyncadd (%p988_p5), %s793_s23, 4294967168  ;;  %s27_s10 = sadd.s32 1, %s1196_s10   ;;  %s1520_s26 = sld [smem:[#allocation13_spill]] }
 0x273   : > { %p24_p12 = scmp.ge.s32.totalorder %s27_s10, 4   ;;  %s1521_s29 = sld [smem:[#allocation15_spill]] }
 0x274   : > { %s1522_s18 = sld [smem:[#allocation14_spill]]  ;;  %s1523_s27 = smov %s1180_s28 }
 0x275   : > { %s1525_s30 = smov %s1192_s9 }
 0x276   :  { %26 = sbr.rel (!%p24_p12) target bundleno = 10 (0xa), region = 121 }
 0x278   : > { %s1524_s28 = smov %s1520_s26 }
 0x27a   : > { %s1526_s9 = smov %s1522_s18 }
 0x27b   :  { %798 = vsyncpa [#allocation5], 1 }
 0x27c   :  { %800 = vsyncpa [#allocation5 + $0x1], 1 }
 0x27d   :  { %801 = vsyncpa [#allocation8], 1 }
 0x27e   :  { %803 = vsyncpa [#allocation8 + $0x1], 1 }
 0x27f   :  { %804 = vsyncpa [#allocation6], 1 }
 0x280   :  { %806 = vsyncpa [#allocation6 + $0x1], 1 }

</bundles_post_ra>
